<compile_context>
chip_gen: v7x
topology: tpu7x:2x2x1
jax: 0.10.0
libtpu: 0.0.40
codegen_flags: <defaults>
</compile_context>

<pallas_src>
import jax
import jax.numpy as jnp
from jax.experimental import pallas as pl
from jax.experimental.pallas import tpu as pltpu


def _round_up(x, m):
    return ((x + m - 1) // m) * m


def _choose_tile_cols(n, c, itemsize):
    """Batch-columns per grid step for the lane-dense (C, N) layout.

    A tile is only sublane_pad(C) * TILE * itemsize bytes, so a ~2 MiB
    double-buffered input tile plus the int32 argmax output tile is a few MiB
    of VMEM on every TPU generation while staying large enough to amortize the
    ~0.35 us per-grid-step overhead.
    """
    sublane = 8 if itemsize >= 4 else (16 if itemsize == 2 else 32)
    c_pad = _round_up(max(c, 1), sublane)
    tile = (2 * 1024 * 1024) // max(c_pad * itemsize, 1)
    tile = max(128, min(tile, 1 << 16))
    tile = (tile // 128) * 128
    if n <= tile:
        return n, 1                       # single block covering the full batch
    return tile, pl.cdiv(n, tile)


def _argmax_kernel(x_ref, o_ref):
    """Per-column argmax of a lane-dense (C, TILE) logits tile."""
    x = x_ref[...]                                    # (C, TILE), native dtype
    c, t = x.shape
    col_max = jnp.max(x, axis=0, keepdims=True)       # (1, TILE)
    cls = jax.lax.broadcasted_iota(jnp.int32, (c, t), 0)
    # First-occurrence tie-break (same as jnp.argmax; torch.argmax does not
    # guarantee an order — only differs on exactly tied logits).
    amax = jnp.min(jnp.where(x == col_max, cls, jnp.int32(c)),
                   axis=0, keepdims=True)             # (1, TILE) int32
    o_ref[...] = amax


def _argmax_rows(y_pred, tile_cols=None):
    """Row-wise argmax of (N, C) logits via the lane-dense Pallas kernel."""
    n, c = y_pred.shape
    y_pred_t = y_pred.T                               # (C, N): batch on lanes

    if tile_cols is None:
        tile, nblocks = _choose_tile_cols(n, c, y_pred.dtype.itemsize)
    else:
        tile = min(int(tile_cols), n)
        assert tile == n or tile % 128 == 0
        nblocks = pl.cdiv(n, tile)

    out = pl.pallas_call(
        _argmax_kernel,
        grid=(nblocks,),
        in_specs=[pl.BlockSpec((c, tile), lambda i: (0, i))],
        out_specs=pl.BlockSpec((1, tile), lambda i: (0, i)),
        out_shape=jax.ShapeDtypeStruct((1, n), jnp.int32),
        compiler_params=pltpu.CompilerParams(
            dimension_semantics=("parallel",),
            vmem_limit_bytes=32 * 1024 * 1024),
    )(y_pred_t)
    return out[0]                                     # (N,) int32


def f1_score_forward(y_pred, y_true, num_classes, epsilon=1e-07, tile_cols=None):
    """Replicates F1_score.forward for a single call (fresh counters).

    # TODO(synk): the stateful cross-call accumulation of self.tp/tn/fp/fn and
    # the .item() host syncs live outside the kernel; only one forward() after
    # reset() is modeled here.
    """
    assert y_pred.ndim == 2
    assert y_true.ndim == 1
    n, c = y_pred.shape
    assert c == num_classes

    amax = _argmax_rows(y_pred, tile_cols=tile_cols)          # (N,) int32
    labels = y_true.astype(jnp.int32)

    # Epilogue: tiny O(N) integer histograms on (argmax, labels) only —
    # reads 2*N int32s; fp/fn/tn follow from exact algebraic identities.
    cls = jnp.arange(num_classes, dtype=jnp.int32)
    pred_oh = amax[:, None] == cls[None, :]                   # (N, C) bool
    true_oh = labels[:, None] == cls[None, :]

    tp_i = jnp.sum(jnp.logical_and(pred_oh, true_oh), axis=0, dtype=jnp.int32)
    pred_hist = jnp.sum(pred_oh, axis=0, dtype=jnp.int32)
    true_hist = jnp.sum(true_oh, axis=0, dtype=jnp.int32)

    tp = tp_i.astype(jnp.float32)
    fp = pred_hist.astype(jnp.float32) - tp
    fn = true_hist.astype(jnp.float32) - tp
    tn = jnp.float32(n) - tp - fp - fn

    precision = tp / (tp + fp + epsilon)
    recall = tp / (tp + fn + epsilon)
    accuracy = tp.sum() / (tp.sum() + tn.sum() + fp.sum() + fn.sum())
    accuracy = accuracy * num_classes
    f1 = 2.0 * (precision * recall) / (precision + recall + epsilon)

    return (accuracy * 100.0,
            precision.mean() * 100.0,
            recall.mean() * 100.0,
            f1.mean() * 100.0)


def _reference(y_pred, y_true, num_classes, epsilon=1e-07):
    """Pure-JAX reference mirroring the PyTorch code."""
    yt = jax.nn.one_hot(y_true, num_classes, dtype=jnp.float32)
    yp = jax.nn.one_hot(jnp.argmax(y_pred, axis=1), num_classes,
                        dtype=jnp.float32)
    tp = (yt * yp).sum(0)
    tn = ((1 - yt) * (1 - yp)).sum(0)
    fp = ((1 - yt) * yp).sum(0)
    fn = (yt * (1 - yp)).sum(0)
    precision = tp / (tp + fp + epsilon)
    recall = tp / (tp + fn + epsilon)
    accuracy = tp.sum() / (tp.sum() + tn.sum() + fp.sum() + fn.sum()) * num_classes
    f1 = 2 * (precision * recall) / (precision + recall + epsilon)
    return (accuracy * 100.0, precision.mean() * 100.0,
            recall.mean() * 100.0, f1.mean() * 100.0)


if __name__ == "__main__":
    key = jax.random.PRNGKey(0)
    k1, k2, k3, k4 = jax.random.split(key, 4)

    # Case 1: tiny f32 problem — single full-array block.
    N1, C1 = 8, 16
    yp1 = jax.random.normal(k1, (N1, C1), dtype=jnp.float32)
    yt1 = jax.random.randint(k2, (N1,), 0, C1, dtype=jnp.int32)
    out1 = jax.block_until_ready(f1_score_forward(yp1, yt1, num_classes=C1))
    ref1 = _reference(yp1, yt1, num_classes=C1)
    for a, b in zip(out1, ref1):
        assert abs(float(a) - float(b)) < 1e-3, (float(a), float(b))

    # Case 2: bf16 logits, batch not a multiple of the tile — exercises the
    # multi-tile parallel grid and the masked partial last tile.
    N2, C2 = 2500, 10
    yp2 = jax.random.normal(k3, (N2, C2), dtype=jnp.float32).astype(jnp.bfloat16)
    yt2 = jax.random.randint(k4, (N2,), 0, C2, dtype=jnp.int32)
    out2 = jax.block_until_ready(
        f1_score_forward(yp2, yt2, num_classes=C2, tile_cols=512))
    ref2 = _reference(yp2.astype(jnp.float32), yt2, num_classes=C2)
    for a, b in zip(out2, ref2):
        assert abs(float(a) - float(b)) < 1e-3, (float(a), float(b))

    print("KERNEL_OK")
</pallas_src>

<mosaic_0001>
module attributes {stable_mosaic.version = 11 : i64} {
  func.func @_argmax_kernel(%arg0: i32, %arg1: memref<16x8xf32, #tpu.memory_space<vmem>>, %arg2: memref<1x8xi32, #tpu.memory_space<vmem>>) attributes {dimension_semantics = [#tpu.dimension_semantics<parallel>], iteration_bounds = array<i64: 1>, scalar_prefetch = 0 : i64, scratch_operands = 0 : i64, tpu.core_type = #tpu.core_type<tc>, window_params = [{transform_indices = @transform_0, window_bounds = array<i64: 16, 8>}, {transform_indices = @transform_1, window_bounds = array<i64: 1, 8>}]} {
    %c0 = arith.constant 0 : index
    %c0_0 = arith.constant 0 : index
    %0 = vector.load %arg1[%c0, %c0_0] : memref<16x8xf32, #tpu.memory_space<vmem>>, vector<16x8xf32>
    %cst = arith.constant dense<0xFF800000> : vector<8xf32>
    %1 = vector.multi_reduction <maximumf>, %0, %cst [0] : vector<16x8xf32> to vector<8xf32>
    %2 = vector.shape_cast %1 : vector<8xf32> to vector<1x8xf32>
    %3 = tpu.iota {dimensions = array<i32: 0>} : vector<16x8xi32>
    %4 = vector.broadcast %2 : vector<1x8xf32> to vector<16x8xf32>
    %5 = arith.cmpf oeq, %0, %4 : vector<16x8xf32>
    %c16_i32 = arith.constant 16 : i32
    %6 = vector.broadcast %c16_i32 : i32 to vector<16x8xi32>
    %7 = arith.select %5, %3, %6 : vector<16x8xi1>, vector<16x8xi32>
    %cst_1 = arith.constant dense<2147483647> : vector<8xi32>
    %8 = vector.multi_reduction <minsi>, %7, %cst_1 [0] : vector<16x8xi32> to vector<8xi32>
    %9 = vector.shape_cast %8 : vector<8xi32> to vector<1x8xi32>
    %c0_2 = arith.constant 0 : index
    %c0_3 = arith.constant 0 : index
    %10 = vector.load %arg2[%c0_2, %c0_3] : memref<1x8xi32, #tpu.memory_space<vmem>>, vector<1x8xi32>
    tpu.vector_store %arg2[%c0_2, %c0_3], %9 {strides = array<i32>} : memref<1x8xi32, #tpu.memory_space<vmem>>, vector<1x8xi32>,
    return
  }
  func.func @transform_0(%arg0: i32) -> (i32, i32) {
    %c0_i32 = arith.constant 0 : i32
    %c0_i32_0 = arith.constant 0 : i32
    return %c0_i32, %arg0 : i32, i32
  }
  func.func @transform_1(%arg0: i32) -> (i32, i32) {
    %c0_i32 = arith.constant 0 : i32
    %c0_i32_0 = arith.constant 0 : i32
    return %c0_i32, %arg0 : i32, i32
  }
}

</mosaic_0001>

<bundles_post_ra>
// kernel: tpu_custom_call.1
= control target key start
LH: loop header
LB: loop body
LE: loop exit
PB: predicated region body
PF: predicated region fallthrough
CT: control target
= control target key end

     0   :  { %vm11_vm0 = vcmask 64512   ;;  %s115_s0 = inlined_call_operand.vmem [shape: f32[16,8], index: 0, kind: input, shape index: {}]   ;;  %s116_s1 = inlined_call_operand.hbm [shape: s32[1,8], index: 1, kind: output, shape index: {}]  }
   0x1   :  { %v9_v0 = vld [vmem:[%s115_s0] sm:$0xff]  ;;  %v10_v1 = vld [vmem:[%s115_s0 + $0x8] sm:$0xff] }
   0x2   :  { %6 = vsyncpa [#allocation3], 0  ;;  %v12_v2 = vsel %vm11_vm0, %v9_v0, -inf  ;;  %v13_v3 = vsel %vm11_vm0, %v10_v1, -inf  ;;  %v21_v6 = vlaneseq  ;;  %s82_s0 = smov [#allocation2]   ;;  %vm41_vm6 = vcmask 57344  }
   0x3   :  { %v14_v4 = vmax.f32 %v12_v2, %v13_v3  ;;  %s49_s10 = sshll.u32 %s82_s0, 4  ;;  %s50_s10 = int_to_ptr.vmem [resolvable:$true] %s49_s10 }
   0x4   :  { %v22_v9 = vshrl.u32 %v21_v6, 7  ;;  %s58_s11 = scalar_lea.vmem %s50_s10, 16  ;;  %s62_s12 = scalar_lea.vmem %s50_s10, 32 }
   0x5   :  { %v15_v5 = vrot.slane %v14_v4, 4  ;;  %p59_p0 = scmp.ne.s32.totalorder %s50_s10, %s58_s11  ;;  %p63_p1 = scmp.lt.s32.totalorder %s50_s10, %s50_s10 }
   0x6   :  { %v23_v12 = vadd.s32 8, %v22_v9  ;;  %p64_p2 = scmp.lt.s32.totalorder %s62_s12, %s58_s11 }
   0x7   :  { %v16_v7 = vmax.f32 %v14_v4, %v15_v5 }
   0x8   :  { %p65_p3 = por %p64_p2, %p63_p1 }
   0x9   :  { %v17_v8 = vrot.slane %v16_v7, 2 }
   0xa   :  { %p66_p4 = pnand %p65_p3, %p59_p0 }
   0xb   :  { %v18_v10 = vmax.f32 %v16_v7, %v17_v8 }
   0xd   :  { %v19_v11 = vrot.slane %v18_v10, 1 }
   0xf   :  { %v20_v13 = vmax.f32 %v18_v10, %v19_v11 }
  0x11   :  { %vm24_vm1 = vcmp.eq.f32.partialorder %v9_v0, %v20_v13  ;;  %vm25_vm2 = vcmp.eq.f32.partialorder %v10_v1, %v20_v13 }
  0x12   :  { %v26_v14 = vsel %vm24_vm1, %v22_v9, 16  ;;  %v27_v15 = vsel %vm25_vm2, %v23_v12, 16 }
  0x13   :  { %v28_v16 = vsel %vm11_vm0, %v26_v14, 2147483647  ;;  %v29_v17 = vsel %vm11_vm0, %v27_v15, 2147483647 }
  0x14   :  { %vm30_vm3 = vcmp.lt.s32.totalorder %v28_v16, %v29_v17 }
  0x15   :  { %v31_v18 = vsel %vm30_vm3, %v28_v16, %v29_v17 }
  0x16   :  { %v32_v19 = vrot.slane %v31_v18, 4 }
  0x18   :  { %vm33_vm4 = vcmp.lt.s32.totalorder %v31_v18, %v32_v19 }
  0x19   :  { %v34_v20 = vsel %vm33_vm4, %v31_v18, %v32_v19 }
  0x1a   :  { %v35_v21 = vrot.slane %v34_v20, 2 }
  0x1c   :  { %vm36_vm5 = vcmp.lt.s32.totalorder %v34_v20, %v35_v21 }
  0x1d   :  { %v37_v22 = vsel %vm36_vm5, %v34_v20, %v35_v21 }
  0x1e   :  { %v38_v23 = vrot.slane %v37_v22, 1 }
  0x20   :  { %vm39_vm7 = vcmp.lt.s32.totalorder %v37_v22, %v38_v23 }
  0x21   :  { %v40_v24 = vsel %vm39_vm7, %v37_v22, %v38_v23 }
  0x22   :  { %42 = vst.msk [vmem:[#allocation2] sm:$0x1] %vm41_vm6, %v40_v24 }
  0x23   :  { %69 = shalt.err (!%p66_p4)
}
  0x24   :  { %s70_s15 = scalar_lea.hbm %s116_s1, 16 }
  0x25   :  { %p71_p5 = scmp.ne.s32.totalorder %s116_s1, %s70_s15  ;;  %p74_p6 = scmp.lt.u32.totalorder %s70_s15, %s116_s1 }
  0x27   :  { %p76_p7 = pnand %p74_p6, %p71_p5 }
  0x29   :  { %79 = shalt.err (!%p76_p7)
}
  0x2a   :  { %52 = dma.vmem_to_hbm [thread:$0]  %s50_s10, 16, %s116_s1, [#allocation3]  }
  0x2b   :  { %80 = dma.done.wait [#allocation3], 16  }
  0x2c   :  { %81 = vsyncadd [#allocation3], 4294967280 }
  0x2d   :  { %56 = vsyncpa [#allocation3], 1 }

</bundles_post_ra>
